<compile_context>
chip_gen: v6e
topology: v6e:2x2x1
jax: 0.10.0
libtpu: 0.0.40
codegen_flags: <defaults>
</compile_context>

<pallas_src>
import jax
import jax.numpy as jnp
from jax.experimental import pallas as pl
from jax.experimental.pallas import tpu as pltpu


_LANE = 128
# Candidate slab widths (multiples of 128), widest first, for fully-flattened inputs.
_COL_CANDIDATES = (4096, 2048, 1024, 512, 256, 128)
# Per-operand VMEM block budget (bytes): ~4 MiB amortizes the ~0.35 us/step overhead.
_BLOCK_BYTES = 4 * 1024 * 1024
# Cap block width so a single sublane-pack row-strip never blows the budget.
_MAX_BLOCK_COLS = 4096
# 3 operands x 2 pipeline buffers x 4 MiB = 24 MiB < 32 MiB (safe on v5e/v6e/v7x).
_VMEM_LIMIT = 32 * 1024 * 1024

_TC_COUNT = None


def _num_tensorcores():
    """Best-effort TensorCore count per chip (2 on v7x, 1 on v5e/v6e)."""
    global _TC_COUNT
    if _TC_COUNT is not None:
        return _TC_COUNT
    count = 1
    try:
        info = pltpu.get_tpu_info()
        for attr in ("num_cores", "core_count", "num_tensorcores",
                     "tensorcore_count", "cores_per_chip", "num_tensor_cores"):
            v = getattr(info, attr, None)
            if isinstance(v, int) and v > 0:
                count = v
                break
    except Exception:
        pass
    if count == 1:
        try:
            kind = jax.devices()[0].device_kind.lower()
            if "v7" in kind:
                count = 2
        except Exception:
            pass
    _TC_COUNT = count
    return count


def _sublane_pack(dtype):
    """Rows per packed sublane group: 8 for 32-bit, 16 for bf16, 32 for int8."""
    itemsize = jnp.dtype(dtype).itemsize
    return max(8, (4 // max(itemsize, 1)) * 8)


def _add_kernel(x_ref, y_ref, o_ref):
    # Elementwise add on the current VMEM tile; dtype promotion happens here
    # (free VPU cast) instead of as a separate full-array XLA pass.
    o_ref[...] = x_ref[...].astype(o_ref.dtype) + y_ref[...].astype(o_ref.dtype)


def _run_add_2d(x2d, y2d, out_dtype):
    rows, cols = x2d.shape
    widest = max(jnp.dtype(d).itemsize for d in (x2d.dtype, y2d.dtype, out_dtype))
    pack = max(_sublane_pack(d) for d in (x2d.dtype, y2d.dtype, out_dtype))
    num_cores = _num_tensorcores()

    # Column blocking (only kicks in for very wide rows).
    block_cols = cols if cols <= _MAX_BLOCK_COLS else _MAX_BLOCK_COLS
    col_blocks = pl.cdiv(cols, block_cols)

    # Target ~_BLOCK_BYTES per operand block, rounded down to the sublane pack.
    target_rows = max(pack, (_BLOCK_BYTES // (block_cols * widest)) // pack * pack)
    block_rows = min(rows, target_rows)

    if block_rows < rows:
        # Multi-block grid: keep block rows a multiple of the sublane pack so
        # stores stay unmasked full `vst`; last partial block is fine.
        block_rows = max(pack, (block_rows // pack) * pack)
    elif num_cores > 1 and col_blocks % num_cores != 0 and rows >= num_cores * pack:
        # Whole array fits in one block but the chip has >1 TensorCore (v7x):
        # split rows so both cores stream HBM.  Single-TC v5e/v6e keep 1 step.
        block_rows = -(-pl.cdiv(rows, num_cores) // pack) * pack

    row_blocks = pl.cdiv(rows, block_rows)

    # v7x megacore balance: keep the total grid a multiple of the TC count so
    # both cores get equal work under dimension_semantics="parallel".
    if (num_cores > 1 and row_blocks > 1
            and (row_blocks * col_blocks) % num_cores != 0
            and rows >= num_cores * pack):
        tgt = -(-row_blocks // num_cores) * num_cores
        block_rows = max(pack, -(-pl.cdiv(rows, tgt) // pack) * pack)
        row_blocks = pl.cdiv(rows, block_rows)

    block_rows = min(block_rows, rows)

    bytes_accessed = rows * cols * (jnp.dtype(x2d.dtype).itemsize
                                    + jnp.dtype(y2d.dtype).itemsize
                                    + jnp.dtype(out_dtype).itemsize)

    return pl.pallas_call(
        _add_kernel,
        out_shape=jax.ShapeDtypeStruct((rows, cols), out_dtype),
        grid_spec=pltpu.PrefetchScalarGridSpec(
            num_scalar_prefetch=0,
            grid=(row_blocks, col_blocks),
            in_specs=[
                pl.BlockSpec((block_rows, block_cols), lambda i, j: (i, j)),
                pl.BlockSpec((block_rows, block_cols), lambda i, j: (i, j)),
            ],
            out_specs=pl.BlockSpec((block_rows, block_cols), lambda i, j: (i, j)),
        ),
        compiler_params=pltpu.CompilerParams(
            dimension_semantics=("parallel", "parallel"),
            vmem_limit_bytes=_VMEM_LIMIT,
        ),
        cost_estimate=pl.CostEstimate(
            flops=rows * cols,
            bytes_accessed=bytes_accessed,
            transcendentals=0,
        ),
    )(x2d, y2d)


def pallas_add(x, y):
    """Elementwise add x + y, computed in a Pallas TPU kernel."""
    x = jnp.asarray(x)
    y = jnp.asarray(y)
    if x.shape != y.shape:
        # TODO(synk): handle broadcasting via stride-0 / row-broadcast BlockSpecs
        # instead of materializing the broadcast in HBM.
        x, y = jnp.broadcast_arrays(x, y)

    orig_shape = x.shape
    out_dtype = jnp.result_type(x.dtype, y.dtype)
    n = x.size
    if n == 0:
        return jnp.zeros(orig_shape, out_dtype)

    last = orig_shape[-1] if len(orig_shape) >= 1 else 1

    # Preferred path: the existing last dim is already lane-dense; collapsing
    # only the leading dims keeps the minor dim (and HBM tiling) untouched.
    if len(orig_shape) >= 2 and last % _LANE == 0:
        x2d = x.reshape(-1, last)
        y2d = y.reshape(-1, last)
        return _run_add_2d(x2d, y2d, out_dtype).reshape(orig_shape)

    # Element count is a multiple of 128: flatten to the widest lane-dense slab.
    # TODO(synk): verify in HLO that this reshape lowers without an HBM relayout
    # copy; if copies appear, fold the add into the producer's layout instead.
    if n % _LANE == 0:
        cols = _LANE
        for c in _COL_CANDIDATES:
            if n % c == 0:
                cols = c
                break
        x2d = x.reshape(n // cols, cols)
        y2d = y.reshape(n // cols, cols)
        return _run_add_2d(x2d, y2d, out_dtype).reshape(orig_shape)

    # Rare path (n not a multiple of 128): Pallas handles the 128-aligned prefix,
    # plain XLA handles the <128-element tail (no padded full-array copies).
    xf = x.reshape(-1)
    yf = y.reshape(-1)
    main = (n // _LANE) * _LANE
    pieces = []
    if main:
        head = _run_add_2d(xf[:main].reshape(-1, _LANE),
                           yf[:main].reshape(-1, _LANE), out_dtype)
        pieces.append(head.reshape(-1))
    pieces.append(xf[main:].astype(out_dtype) + yf[main:].astype(out_dtype))
    flat = pieces[0] if len(pieces) == 1 else jnp.concatenate(pieces)
    return flat.reshape(orig_shape)


if __name__ == "__main__":
    key = jax.random.PRNGKey(0)
    kx, ky = jax.random.split(key)

    # NCHW activations, matching the PyTorch module's typical usage.
    x = jax.random.normal(kx, (2, 4, 16, 16), dtype=jnp.float32)
    y = jax.random.normal(ky, (2, 4, 16, 16), dtype=jnp.float32)
    out = pallas_add(x, y)
    jax.block_until_ready(out)
    ref = x + y
    assert out.shape == ref.shape
    assert out.dtype == ref.dtype
    assert jnp.allclose(out, ref, atol=1e-6, rtol=1e-6)

    # Lane-dense last dim (layout-preserving leading-dim collapse path).
    x1 = jax.random.normal(kx, (2, 8, 256), dtype=jnp.float32)
    y1 = jax.random.normal(ky, (2, 8, 256), dtype=jnp.float32)
    out1 = pallas_add(x1, y1)
    jax.block_until_ready(out1)
    assert jnp.allclose(out1, x1 + y1, atol=1e-6, rtol=1e-6)

    # Mixed-dtype promotion handled inside the kernel.
    xb = jax.random.normal(kx, (4, 8, 128), dtype=jnp.bfloat16)
    yf32 = jax.random.normal(ky, (4, 8, 128), dtype=jnp.float32)
    outm = pallas_add(xb, yf32)
    jax.block_until_ready(outm)
    refm = xb + yf32
    assert outm.dtype == refm.dtype
    assert jnp.allclose(outm, refm, atol=1e-6, rtol=1e-6)

    # Non-128-divisible size: Pallas prefix + XLA tail path.
    x2 = jax.random.normal(kx, (5, 40), dtype=jnp.float32)
    y2 = jax.random.normal(ky, (5, 40), dtype=jnp.float32)
    out2 = pallas_add(x2, y2)
    jax.block_until_ready(out2)
    assert jnp.allclose(out2, x2 + y2, atol=1e-6, rtol=1e-6)

    # Tiny tensor, fully sub-128 tail.
    x3 = jax.random.normal(kx, (3, 5, 7), dtype=jnp.float32)
    y3 = jax.random.normal(ky, (3, 5, 7), dtype=jnp.float32)
    out3 = pallas_add(x3, y3)
    jax.block_until_ready(out3)
    assert jnp.allclose(out3, x3 + y3, atol=1e-6, rtol=1e-6)

    print("KERNEL_OK")
</pallas_src>

<mosaic_0001>
module attributes {stable_mosaic.version = 11 : i64} {
  func.func @_add_kernel(%arg0: i32, %arg1: i32, %arg2: memref<1x2048xf32, #tpu.memory_space<vmem>>, %arg3: memref<1x2048xf32, #tpu.memory_space<vmem>>, %arg4: memref<1x2048xf32, #tpu.memory_space<vmem>>) attributes {dimension_semantics = [#tpu.dimension_semantics<parallel>, #tpu.dimension_semantics<parallel>], iteration_bounds = array<i64: 1, 1>, scalar_prefetch = 0 : i64, scratch_operands = 0 : i64, tpu.core_type = #tpu.core_type<tc>, window_params = [{transform_indices = @transform_0, window_bounds = array<i64: 1, 2048>}, {transform_indices = @transform_1, window_bounds = array<i64: 1, 2048>}, {transform_indices = @transform_2, window_bounds = array<i64: 1, 2048>}]} {
    %c0 = arith.constant 0 : index
    %c0_0 = arith.constant 0 : index
    %0 = vector.load %arg2[%c0, %c0_0] : memref<1x2048xf32, #tpu.memory_space<vmem>>, vector<1x2048xf32>
    %c0_1 = arith.constant 0 : index
    %c0_2 = arith.constant 0 : index
    %1 = vector.load %arg3[%c0_1, %c0_2] : memref<1x2048xf32, #tpu.memory_space<vmem>>, vector<1x2048xf32>
    %2 = arith.addf %0, %1 : vector<1x2048xf32>
    %c0_3 = arith.constant 0 : index
    %c0_4 = arith.constant 0 : index
    %3 = vector.load %arg4[%c0_3, %c0_4] : memref<1x2048xf32, #tpu.memory_space<vmem>>, vector<1x2048xf32>
    tpu.vector_store %arg4[%c0_3, %c0_4], %2 {strides = array<i32>} : memref<1x2048xf32, #tpu.memory_space<vmem>>, vector<1x2048xf32>,
    return
  }
  func.func @transform_0(%arg0: i32, %arg1: i32) -> (i32, i32) {
    %c0_i32 = arith.constant 0 : i32
    return %arg0, %arg1 : i32, i32
  }
  func.func @transform_1(%arg0: i32, %arg1: i32) -> (i32, i32) {
    %c0_i32 = arith.constant 0 : i32
    return %arg0, %arg1 : i32, i32
  }
  func.func @transform_2(%arg0: i32, %arg1: i32) -> (i32, i32) {
    %c0_i32 = arith.constant 0 : i32
    return %arg0, %arg1 : i32, i32
  }
}

</mosaic_0001>

<bundles_post_ra>
// kernel: tpu_custom_call.1
= control target key start
LH: loop header
LB: loop body
LE: loop exit
PB: predicated region body
PF: predicated region fallthrough
CT: control target
= control target key end

     0   :  { %7 = vsyncpa [#allocation3], 0  ;;  %s156_s0 = inlined_call_operand.hbm [shape: f32[1,2048], index: 0, kind: input, shape index: {}]   ;;  %s157_s1 = inlined_call_operand.hbm [shape: f32[1,2048], index: 1, kind: input, shape index: {}]   ;;  %s158_s2 = inlined_call_operand.hbm [shape: f32[1,2048], index: 2, kind: output, shape index: {}]  }
   0x1   :  { %8 = vsyncpa [#allocation6], 0 }
   0x2   :  { %9 = vsyncpa [#allocation4], 0  ;;  %s129_s9 = smov [#allocation2]   ;;  %s130_s11 = smov [#allocation5]  }
   0x3   :  { %s16_s10 = sshll.u32 %s129_s9, 4  ;;  %s26_s12 = sshll.u32 %s130_s11, 4  ;;  %s17_s10 = int_to_ptr.vmem [resolvable:$true] %s16_s10  ;;  %s27_s12 = int_to_ptr.vmem [resolvable:$true] %s26_s12 }
   0x4   :  { %s71_s13 = scalar_lea.vmem %s17_s10, 256  ;;  %p76_p1 = scmp.lt.s32.totalorder %s17_s10, %s17_s10 }
   0x5   :  { %p72_p0 = scmp.ne.s32.totalorder %s17_s10, %s71_s13  ;;  %p77_p2 = scmp.lt.s32.totalorder %s71_s13, %s71_s13 }
   0x7   :  { %p78_p3 = por %p77_p2, %p76_p1 }
   0x9   :  { %p79_p4 = pnand %p78_p3, %p72_p0 }
   0xb   :  { %82 = shalt.err (!%p79_p4)
}
   0xc   :  { %19 = dma.hbm_to_vmem [thread:$0]  %s156_s0, 256, %s17_s10, [#allocation3]  }
   0xd   :  { %s91_s16 = scalar_lea.vmem %s27_s12, 256  ;;  %p96_p6 = scmp.lt.s32.totalorder %s27_s12, %s27_s12 }
   0xe   :  { %p92_p5 = scmp.ne.s32.totalorder %s27_s12, %s91_s16  ;;  %p97_p7 = scmp.lt.s32.totalorder %s91_s16, %s91_s16 }
  0x10   :  { %p98_p8 = por %p97_p7, %p96_p6 }
  0x12   :  { %p99_p9 = pnand %p98_p8, %p92_p5 }
  0x14   :  { %102 = shalt.err (!%p99_p9)
}
  0x15   :  { %29 = dma.hbm_to_vmem [thread:$0]  %s157_s1, 256, %s27_s12, [#allocation6]  }
  0x16   :  { %123 = dma.done.wait [#allocation3], 256  }
  0x17   :  { %124 = vsyncadd [#allocation3], 4294967040 }
  0x18   :  { %125 = dma.done.wait [#allocation6], 256  }
  0x19   :  { %126 = vsyncadd [#allocation6], 4294967040  ;;  %s131_s19 = smov [#allocation7]   ;;  %v36_v0 = vld [vmem:[#allocation2] sm:$0xff]  ;;  %v38_v1 = vld [vmem:[#allocation5] sm:$0xff] }
  0x1a   :  { %s50_s20 = sshll.u32 %s131_s19, 4  ;;  %v37_v2 = vld [vmem:[#allocation2 + $0x8] sm:$0xff]  ;;  %v40_v3 = vadd.f32 %v38_v1, %v36_v0  ;;  %v39_v4 = vld [vmem:[#allocation5 + $0x8] sm:$0xff]  ;;  %s51_s20 = int_to_ptr.vmem [resolvable:$true] %s50_s20 }
  0x1b   :  { %v41_v5 = vadd.f32 %v39_v4, %v37_v2  ;;  %s103_s0 = scalar_lea.vmem %s51_s20, 256  ;;  %p108_p11 = scmp.lt.s32.totalorder %s51_s20, %s51_s20 }
  0x1c   :  { %42 = vst [vmem:[#allocation7] sm:$0xff] %v40_v3  ;;  %p104_p10 = scmp.ne.s32.totalorder %s51_s20, %s103_s0  ;;  %p109_p12 = scmp.lt.s32.totalorder %s103_s0, %s103_s0 }
  0x1d   :  { %43 = vst [vmem:[#allocation7 + $0x8] sm:$0xff] %v41_v5 }
  0x1e   :  { %p110_p13 = por %p109_p12, %p108_p11 }
  0x20   :  { %p111_p0 = pnand %p110_p13, %p104_p10 }
  0x22   :  { %114 = shalt.err (!%p111_p0)
}
  0x23   :  { %53 = dma.vmem_to_hbm [thread:$0]  %s51_s20, 256, %s158_s2, [#allocation4]  }
  0x24   :  { %127 = dma.done.wait [#allocation4], 256  }
  0x25   :  { %128 = vsyncadd [#allocation4], 4294967040 }
  0x26   :  { %57 = vsyncpa [#allocation3], 1 }
  0x27   :  { %58 = vsyncpa [#allocation6], 1 }
  0x28   :  { %59 = vsyncpa [#allocation4], 1 }

</bundles_post_ra>
